<compile_context>
chip_gen: v5e
topology: v5e:2x2
jax: 0.10.0
libtpu: 0.0.40
codegen_flags: <defaults>
</compile_context>

<pallas_src>
import numpy as np
import jax
import jax.numpy as jnp
from jax.experimental import pallas as pl
from jax.experimental.pallas import tpu as pltpu


# --------------------------------------------------------------------------
# Host-side helpers (tiny, trace-time constants)
# --------------------------------------------------------------------------
def _block_diag(wb):
    """(nb, bs, bs) -> dense block-diagonal (nb*bs, nb*bs)."""
    nb, bs, _ = wb.shape
    eye = jnp.eye(nb, dtype=wb.dtype)
    return (eye[:, None, :, None] * wb[:, :, None, :]).reshape(nb * bs, nb * bs)


def _dft_matrices(h, w):
    """Real DFT matrices reproducing rfft2 / irfft2 (axes=(1,2), norm='ortho').

      xf_r = Fr @ X,  xf_i = Fi @ X        X:   (h*w, C) spatial tokens
      Y    = Gr @ yr + Gi @ yi             Y:   (h*w, C) spatial output
    with frequency bins flattened as k = u*Wf + v, Wf = w//2 + 1.
    Built in float64 so the f32 cast is the only rounding.
    """
    Wf = w // 2 + 1
    u = np.arange(h).reshape(h, 1, 1, 1).astype(np.float64)
    v = np.arange(Wf).reshape(1, Wf, 1, 1).astype(np.float64)
    p = np.arange(h).reshape(1, 1, h, 1).astype(np.float64)
    q = np.arange(w).reshape(1, 1, 1, w).astype(np.float64)
    theta = 2.0 * np.pi * (u * p / h + v * q / w)          # (h, Wf, h, w)
    theta = theta.reshape(h * Wf, h * w)
    s = 1.0 / np.sqrt(h * w)
    Fr = np.cos(theta) * s                                   # (K, N)
    Fi = -np.sin(theta) * s                                  # (K, N)
    # irfft2 weights: middle bins count twice (hermitian reflection), DC and
    # (even w) Nyquist once; their imaginary parts never reach the real output.
    a = np.full((Wf,), 2.0)
    a[0] = 1.0
    if w % 2 == 0:
        a[Wf - 1] = 1.0
    af = np.tile(a, h)                                       # (K,)
    Gr = (Fr * af[:, None]).T                                # (N, K)
    Gi = (Fi * af[:, None]).T                                # (N, K)
    to = lambda m: jnp.asarray(m, jnp.float32)
    return to(Fr), to(Fi), to(Gr), to(Gi)


# --------------------------------------------------------------------------
# Fused Pallas kernel: per-sample  DFT -> complex MLP -> iDFT -> bias+residual
# --------------------------------------------------------------------------
def _afno_fused_kernel(x_ref, fr_ref, fi_ref, gr_ref, gi_ref,
                       w1r_ref, w1i_ref, w2r_ref, w2i_ref,
                       b1r_ref, b1i_ref, b2r_ref, b2i_ref,
                       wct_ref, bc_ref, o_ref):
    f32 = jnp.float32
    x = x_ref[...]                                                    # (N, C)

    # rfft2 (norm='ortho') as two real matmuls.
    xr = jnp.dot(fr_ref[...], x, preferred_element_type=f32)         # (K, C)
    xi = jnp.dot(fi_ref[...], x, preferred_element_type=f32)         # (K, C)

    # Block-diagonal complex MLP (dense (C,C) weights, real/imag kept apart).
    h_r = jnp.maximum(
        jnp.dot(xr, w1r_ref[...], preferred_element_type=f32)
        - jnp.dot(xi, w1i_ref[...], preferred_element_type=f32)
        + b1r_ref[...], 0.0)
    h_i = jnp.maximum(
        jnp.dot(xr, w1i_ref[...], preferred_element_type=f32)
        + jnp.dot(xi, w1r_ref[...], preferred_element_type=f32)
        + b1i_ref[...], 0.0)
    y_r = (jnp.dot(h_r, w2r_ref[...], preferred_element_type=f32)
           - jnp.dot(h_i, w2i_ref[...], preferred_element_type=f32)
           + b2r_ref[...])
    # PyTorch quirk: the imag update reuses the already-updated real part.
    y_i = (jnp.dot(y_r, w2i_ref[...], preferred_element_type=f32)
           + jnp.dot(h_i, w2r_ref[...], preferred_element_type=f32)
           + b2i_ref[...])

    # irfft2 (s=(h,w), norm='ortho') as two real matmuls.
    y = (jnp.dot(gr_ref[...], y_r, preferred_element_type=f32)
         + jnp.dot(gi_ref[...], y_i, preferred_element_type=f32))    # (N, C)

    # Fused Conv1d(kernel=1) bias path + residual add.
    o_ref[...] = (y
                  + jnp.dot(x, wct_ref[...], preferred_element_type=f32)
                  + bc_ref[...])


def afno_forward(x, params, h, w, num_blocks=2):
    B, N, C = x.shape
    assert N == h * w
    assert C % num_blocks == 0
    Wf = w // 2 + 1
    K = h * Wf

    # --- trace-time constant prep (tiny) ----------------------------------
    Fr, Fi, Gr, Gi = _dft_matrices(h, w)
    W1r = _block_diag(params["w1"][0]); W1i = _block_diag(params["w1"][1])
    W2r = _block_diag(params["w2"][0]); W2i = _block_diag(params["w2"][1])
    b1r = params["b1"][0].reshape(1, C); b1i = params["b1"][1].reshape(1, C)
    b2r = params["b2"][0].reshape(1, C); b2i = params["b2"][1].reshape(1, C)
    wct = params["conv_w"].T                       # (C_in, C_out): out = x @ W^T
    bc = params["conv_b"].reshape(1, C)
    # softshrink(lambd=0.0): the PyTorch guard `if self.softshrink` is falsy,
    # so it is correctly skipped here.

    def _const_spec(shape):
        return pl.BlockSpec(shape, lambda b: (0,) * len(shape))

    out = pl.pallas_call(
        _afno_fused_kernel,
        out_shape=jax.ShapeDtypeStruct((B, N, C), jnp.float32),
        grid=(B,),
        in_specs=[
            pl.BlockSpec((None, N, C), lambda b: (b, 0, 0)),   # x  (one sample)
            _const_spec((K, N)),                               # Fr
            _const_spec((K, N)),                               # Fi
            _const_spec((N, K)),                               # Gr
            _const_spec((N, K)),                               # Gi
            _const_spec((C, C)),                               # W1r
            _const_spec((C, C)),                               # W1i
            _const_spec((C, C)),                               # W2r
            _const_spec((C, C)),                               # W2i
            _const_spec((1, C)),                               # b1r
            _const_spec((1, C)),                               # b1i
            _const_spec((1, C)),                               # b2r
            _const_spec((1, C)),                               # b2i
            _const_spec((C, C)),                               # conv W^T
            _const_spec((1, C)),                               # conv bias
        ],
        out_specs=pl.BlockSpec((None, N, C), lambda b: (b, 0, 0)),
        compiler_params=pltpu.CompilerParams(
            dimension_semantics=("parallel",)),
    )(x, Fr, Fi, Gr, Gi, W1r, W1i, W2r, W2i,
      b1r, b1i, b2r, b2i, wct, bc)
    return out


# --------------------------------------------------------------------------
# Pure-JAX reference (mirrors the PyTorch statement order exactly, including
# the reuse of the already-updated x_real in the x_imag line).
# --------------------------------------------------------------------------
def afno_reference(x, params, h, w, num_blocks=2):
    B, N, C = x.shape
    bs = C // num_blocks
    hi = jax.lax.Precision.HIGHEST
    bias = jnp.einsum("mnc,oc->mno", x, params["conv_w"], precision=hi) \
        + params["conv_b"]
    xg = x.reshape(B, h, w, C)
    xf = jnp.fft.rfft2(xg, axes=(1, 2), norm="ortho")
    Hf, Wf = xf.shape[1], xf.shape[2]
    xf = xf.reshape(B, Hf, Wf, num_blocks, bs)
    xr, xi = jnp.real(xf), jnp.imag(xf)
    mul = lambda a, wgt: jnp.einsum("...bd,bdk->...bk", a, wgt, precision=hi)
    w1, b1, w2, b2 = params["w1"], params["b1"], params["w2"], params["b2"]
    hr = jax.nn.relu(mul(xr, w1[0]) - mul(xi, w1[1]) + b1[0])
    hh = jax.nn.relu(mul(xr, w1[1]) + mul(xi, w1[0]) + b1[1])
    yr = mul(hr, w2[0]) - mul(hh, w2[1]) + b2[0]
    yi = mul(yr, w2[1]) + mul(hh, w2[0]) + b2[1]     # PyTorch quirk: updated yr
    yf = (yr + 1j * yi).reshape(B, Hf, Wf, C)
    y = jnp.fft.irfft2(yf, s=(h, w), axes=(1, 2), norm="ortho")
    return y.reshape(B, N, C) + bias


if __name__ == "__main__":
    # Small shapes consistent with the module: dim=C=32, h=w=8 -> N=64, B=2.
    B, h, w, C = 2, 8, 8, 32
    N = h * w
    num_blocks = 2
    bs = C // num_blocks
    scale = 0.02

    key = jax.random.PRNGKey(0)
    k_x, k_w1, k_b1, k_w2, k_b2, k_cw, k_cb = jax.random.split(key, 7)

    params = {
        "w1": scale * jax.random.normal(k_w1, (2, num_blocks, bs, bs), jnp.float32),
        "b1": scale * jax.random.normal(k_b1, (2, num_blocks, bs), jnp.float32),
        "w2": scale * jax.random.normal(k_w2, (2, num_blocks, bs, bs), jnp.float32),
        "b2": scale * jax.random.normal(k_b2, (2, num_blocks, bs), jnp.float32),
        "conv_w": scale * jax.random.normal(k_cw, (C, C), jnp.float32),  # (out, in)
        "conv_b": scale * jax.random.normal(k_cb, (C,), jnp.float32),
    }
    x = jax.random.normal(k_x, (B, N, C), jnp.float32)

    fwd = jax.jit(afno_forward, static_argnums=(2, 3, 4))
    out = jax.block_until_ready(fwd(x, params, h, w, num_blocks))
    ref = jax.block_until_ready(afno_reference(x, params, h, w, num_blocks))

    assert out.shape == (B, N, C)
    # Expected kernel-vs-reference gap is ~1e-5 (f32 DFT-matmul vs library FFT);
    # the tolerance leaves margin for multi-pass MXU f32 rounding.
    assert jnp.allclose(out, ref, atol=1e-3, rtol=1e-3)

    print("KERNEL_OK")
</pallas_src>

<mosaic_0001>
module attributes {stable_mosaic.version = 11 : i64} {
  func.func @_afno_fused_kernel(%arg0: i32, %arg1: memref<1x64x32xf32, #tpu.memory_space<vmem>>, %arg2: memref<40x64xf32, #tpu.memory_space<vmem>>, %arg3: memref<40x64xf32, #tpu.memory_space<vmem>>, %arg4: memref<64x40xf32, #tpu.memory_space<vmem>>, %arg5: memref<64x40xf32, #tpu.memory_space<vmem>>, %arg6: memref<32x32xf32, #tpu.memory_space<vmem>>, %arg7: memref<32x32xf32, #tpu.memory_space<vmem>>, %arg8: memref<32x32xf32, #tpu.memory_space<vmem>>, %arg9: memref<32x32xf32, #tpu.memory_space<vmem>>, %arg10: memref<1x32xf32, #tpu.memory_space<vmem>>, %arg11: memref<1x32xf32, #tpu.memory_space<vmem>>, %arg12: memref<1x32xf32, #tpu.memory_space<vmem>>, %arg13: memref<1x32xf32, #tpu.memory_space<vmem>>, %arg14: memref<32x32xf32, #tpu.memory_space<vmem>>, %arg15: memref<1x32xf32, #tpu.memory_space<vmem>>, %arg16: memref<1x64x32xf32, #tpu.memory_space<vmem>>) attributes {dimension_semantics = [#tpu.dimension_semantics<parallel>], iteration_bounds = array<i64: 2>, scalar_prefetch = 0 : i64, scratch_operands = 0 : i64, tpu.core_type = #tpu.core_type<tc>, window_params = [{transform_indices = @transform_0, window_bounds = array<i64: 1, 64, 32>}, {pipeline_mode = #tpu.pipeline_mode<synchronous>, transform_indices = @transform_1, window_bounds = array<i64: 40, 64>}, {pipeline_mode = #tpu.pipeline_mode<synchronous>, transform_indices = @transform_2, window_bounds = array<i64: 40, 64>}, {pipeline_mode = #tpu.pipeline_mode<synchronous>, transform_indices = @transform_3, window_bounds = array<i64: 64, 40>}, {pipeline_mode = #tpu.pipeline_mode<synchronous>, transform_indices = @transform_4, window_bounds = array<i64: 64, 40>}, {pipeline_mode = #tpu.pipeline_mode<synchronous>, transform_indices = @transform_5, window_bounds = array<i64: 32, 32>}, {pipeline_mode = #tpu.pipeline_mode<synchronous>, transform_indices = @transform_6, window_bounds = array<i64: 32, 32>}, {pipeline_mode = #tpu.pipeline_mode<synchronous>, transform_indices = @transform_7, window_bounds = array<i64: 32, 32>}, {pipeline_mode = #tpu.pipeline_mode<synchronous>, transform_indices = @transform_8, window_bounds = array<i64: 32, 32>}, {pipeline_mode = #tpu.pipeline_mode<synchronous>, transform_indices = @transform_9, window_bounds = array<i64: 1, 32>}, {pipeline_mode = #tpu.pipeline_mode<synchronous>, transform_indices = @transform_10, window_bounds = array<i64: 1, 32>}, {pipeline_mode = #tpu.pipeline_mode<synchronous>, transform_indices = @transform_11, window_bounds = array<i64: 1, 32>}, {pipeline_mode = #tpu.pipeline_mode<synchronous>, transform_indices = @transform_12, window_bounds = array<i64: 1, 32>}, {pipeline_mode = #tpu.pipeline_mode<synchronous>, transform_indices = @transform_13, window_bounds = array<i64: 32, 32>}, {pipeline_mode = #tpu.pipeline_mode<synchronous>, transform_indices = @transform_14, window_bounds = array<i64: 1, 32>}, {transform_indices = @transform_15, window_bounds = array<i64: 1, 64, 32>}]} {
    %c0 = arith.constant 0 : index
    %c0_0 = arith.constant 0 : index
    %c0_1 = arith.constant 0 : index
    %0 = vector.load %arg1[%c0, %c0_0, %c0_1] : memref<1x64x32xf32, #tpu.memory_space<vmem>>, vector<1x64x32xf32>
    %1 = vector.shape_cast %0 : vector<1x64x32xf32> to vector<64x32xf32>
    %c0_2 = arith.constant 0 : index
    %c0_3 = arith.constant 0 : index
    %2 = vector.load %arg2[%c0_2, %c0_3] : memref<40x64xf32, #tpu.memory_space<vmem>>, vector<40x64xf32>
    %cst = arith.constant dense<0.000000e+00> : vector<40x32xf32>
    %3 = tpu.matmul %2, %1, %cst {dimension_numbers = #tpu.dot_dimension_numbers<[1], [0], [0], [1], [0, 0, 1, 1], [], []>} : vector<40x64xf32>, vector<64x32xf32>, vector<40x32xf32> -> vector<40x32xf32>
    %c0_4 = arith.constant 0 : index
    %c0_5 = arith.constant 0 : index
    %4 = vector.load %arg3[%c0_4, %c0_5] : memref<40x64xf32, #tpu.memory_space<vmem>>, vector<40x64xf32>
    %cst_6 = arith.constant dense<0.000000e+00> : vector<40x32xf32>
    %5 = tpu.matmul %4, %1, %cst_6 {dimension_numbers = #tpu.dot_dimension_numbers<[1], [0], [0], [1], [0, 0, 1, 1], [], []>} : vector<40x64xf32>, vector<64x32xf32>, vector<40x32xf32> -> vector<40x32xf32>
    %c0_7 = arith.constant 0 : index
    %c0_8 = arith.constant 0 : index
    %6 = vector.load %arg6[%c0_7, %c0_8] : memref<32x32xf32, #tpu.memory_space<vmem>>, vector<32x32xf32>
    %cst_9 = arith.constant dense<0.000000e+00> : vector<40x32xf32>
    %7 = tpu.matmul %3, %6, %cst_9 {dimension_numbers = #tpu.dot_dimension_numbers<[1], [0], [0], [1], [0, 0, 1, 1], [], []>} : vector<40x32xf32>, vector<32x32xf32>, vector<40x32xf32> -> vector<40x32xf32>
    %c0_10 = arith.constant 0 : index
    %c0_11 = arith.constant 0 : index
    %8 = vector.load %arg7[%c0_10, %c0_11] : memref<32x32xf32, #tpu.memory_space<vmem>>, vector<32x32xf32>
    %cst_12 = arith.constant dense<0.000000e+00> : vector<40x32xf32>
    %9 = tpu.matmul %5, %8, %cst_12 {dimension_numbers = #tpu.dot_dimension_numbers<[1], [0], [0], [1], [0, 0, 1, 1], [], []>} : vector<40x32xf32>, vector<32x32xf32>, vector<40x32xf32> -> vector<40x32xf32>
    %10 = arith.subf %7, %9 : vector<40x32xf32>
    %c0_13 = arith.constant 0 : index
    %c0_14 = arith.constant 0 : index
    %11 = vector.load %arg10[%c0_13, %c0_14] : memref<1x32xf32, #tpu.memory_space<vmem>>, vector<1x32xf32>
    %12 = vector.broadcast %11 : vector<1x32xf32> to vector<40x32xf32>
    %13 = arith.addf %10, %12 : vector<40x32xf32>
    %cst_15 = arith.constant 0.000000e+00 : f32
    %14 = vector.broadcast %cst_15 : f32 to vector<40x32xf32>
    %15 = arith.maximumf %13, %14 : vector<40x32xf32>
    %c0_16 = arith.constant 0 : index
    %c0_17 = arith.constant 0 : index
    %16 = vector.load %arg7[%c0_16, %c0_17] : memref<32x32xf32, #tpu.memory_space<vmem>>, vector<32x32xf32>
    %cst_18 = arith.constant dense<0.000000e+00> : vector<40x32xf32>
    %17 = tpu.matmul %3, %16, %cst_18 {dimension_numbers = #tpu.dot_dimension_numbers<[1], [0], [0], [1], [0, 0, 1, 1], [], []>} : vector<40x32xf32>, vector<32x32xf32>, vector<40x32xf32> -> vector<40x32xf32>
    %c0_19 = arith.constant 0 : index
    %c0_20 = arith.constant 0 : index
    %18 = vector.load %arg6[%c0_19, %c0_20] : memref<32x32xf32, #tpu.memory_space<vmem>>, vector<32x32xf32>
    %cst_21 = arith.constant dense<0.000000e+00> : vector<40x32xf32>
    %19 = tpu.matmul %5, %18, %cst_21 {dimension_numbers = #tpu.dot_dimension_numbers<[1], [0], [0], [1], [0, 0, 1, 1], [], []>} : vector<40x32xf32>, vector<32x32xf32>, vector<40x32xf32> -> vector<40x32xf32>
    %20 = arith.addf %17, %19 : vector<40x32xf32>
    %c0_22 = arith.constant 0 : index
    %c0_23 = arith.constant 0 : index
    %21 = vector.load %arg11[%c0_22, %c0_23] : memref<1x32xf32, #tpu.memory_space<vmem>>, vector<1x32xf32>
    %22 = vector.broadcast %21 : vector<1x32xf32> to vector<40x32xf32>
    %23 = arith.addf %20, %22 : vector<40x32xf32>
    %cst_24 = arith.constant 0.000000e+00 : f32
    %24 = vector.broadcast %cst_24 : f32 to vector<40x32xf32>
    %25 = arith.maximumf %23, %24 : vector<40x32xf32>
    %c0_25 = arith.constant 0 : index
    %c0_26 = arith.constant 0 : index
    %26 = vector.load %arg8[%c0_25, %c0_26] : memref<32x32xf32, #tpu.memory_space<vmem>>, vector<32x32xf32>
    %cst_27 = arith.constant dense<0.000000e+00> : vector<40x32xf32>
    %27 = tpu.matmul %15, %26, %cst_27 {dimension_numbers = #tpu.dot_dimension_numbers<[1], [0], [0], [1], [0, 0, 1, 1], [], []>} : vector<40x32xf32>, vector<32x32xf32>, vector<40x32xf32> -> vector<40x32xf32>
    %c0_28 = arith.constant 0 : index
    %c0_29 = arith.constant 0 : index
    %28 = vector.load %arg9[%c0_28, %c0_29] : memref<32x32xf32, #tpu.memory_space<vmem>>, vector<32x32xf32>
    %cst_30 = arith.constant dense<0.000000e+00> : vector<40x32xf32>
    %29 = tpu.matmul %25, %28, %cst_30 {dimension_numbers = #tpu.dot_dimension_numbers<[1], [0], [0], [1], [0, 0, 1, 1], [], []>} : vector<40x32xf32>, vector<32x32xf32>, vector<40x32xf32> -> vector<40x32xf32>
    %30 = arith.subf %27, %29 : vector<40x32xf32>
    %c0_31 = arith.constant 0 : index
    %c0_32 = arith.constant 0 : index
    %31 = vector.load %arg12[%c0_31, %c0_32] : memref<1x32xf32, #tpu.memory_space<vmem>>, vector<1x32xf32>
    %32 = vector.broadcast %31 : vector<1x32xf32> to vector<40x32xf32>
    %33 = arith.addf %30, %32 : vector<40x32xf32>
    %c0_33 = arith.constant 0 : index
    %c0_34 = arith.constant 0 : index
    %34 = vector.load %arg9[%c0_33, %c0_34] : memref<32x32xf32, #tpu.memory_space<vmem>>, vector<32x32xf32>
    %cst_35 = arith.constant dense<0.000000e+00> : vector<40x32xf32>
    %35 = tpu.matmul %33, %34, %cst_35 {dimension_numbers = #tpu.dot_dimension_numbers<[1], [0], [0], [1], [0, 0, 1, 1], [], []>} : vector<40x32xf32>, vector<32x32xf32>, vector<40x32xf32> -> vector<40x32xf32>
    %c0_36 = arith.constant 0 : index
    %c0_37 = arith.constant 0 : index
    %36 = vector.load %arg8[%c0_36, %c0_37] : memref<32x32xf32, #tpu.memory_space<vmem>>, vector<32x32xf32>
    %cst_38 = arith.constant dense<0.000000e+00> : vector<40x32xf32>
    %37 = tpu.matmul %25, %36, %cst_38 {dimension_numbers = #tpu.dot_dimension_numbers<[1], [0], [0], [1], [0, 0, 1, 1], [], []>} : vector<40x32xf32>, vector<32x32xf32>, vector<40x32xf32> -> vector<40x32xf32>
    %38 = arith.addf %35, %37 : vector<40x32xf32>
    %c0_39 = arith.constant 0 : index
    %c0_40 = arith.constant 0 : index
    %39 = vector.load %arg13[%c0_39, %c0_40] : memref<1x32xf32, #tpu.memory_space<vmem>>, vector<1x32xf32>
    %40 = vector.broadcast %39 : vector<1x32xf32> to vector<40x32xf32>
    %41 = arith.addf %38, %40 : vector<40x32xf32>
    %c0_41 = arith.constant 0 : index
    %c0_42 = arith.constant 0 : index
    %42 = vector.load %arg4[%c0_41, %c0_42] : memref<64x40xf32, #tpu.memory_space<vmem>>, vector<64x40xf32>
    %cst_43 = arith.constant dense<0.000000e+00> : vector<64x32xf32>
    %43 = tpu.matmul %42, %33, %cst_43 {dimension_numbers = #tpu.dot_dimension_numbers<[1], [0], [0], [1], [0, 0, 1, 1], [], []>} : vector<64x40xf32>, vector<40x32xf32>, vector<64x32xf32> -> vector<64x32xf32>
    %c0_44 = arith.constant 0 : index
    %c0_45 = arith.constant 0 : index
    %44 = vector.load %arg5[%c0_44, %c0_45] : memref<64x40xf32, #tpu.memory_space<vmem>>, vector<64x40xf32>
    %cst_46 = arith.constant dense<0.000000e+00> : vector<64x32xf32>
    %45 = tpu.matmul %44, %41, %cst_46 {dimension_numbers = #tpu.dot_dimension_numbers<[1], [0], [0], [1], [0, 0, 1, 1], [], []>} : vector<64x40xf32>, vector<40x32xf32>, vector<64x32xf32> -> vector<64x32xf32>
    %46 = arith.addf %43, %45 : vector<64x32xf32>
    %c0_47 = arith.constant 0 : index
    %c0_48 = arith.constant 0 : index
    %47 = vector.load %arg14[%c0_47, %c0_48] : memref<32x32xf32, #tpu.memory_space<vmem>>, vector<32x32xf32>
    %cst_49 = arith.constant dense<0.000000e+00> : vector<64x32xf32>
    %48 = tpu.matmul %1, %47, %cst_49 {dimension_numbers = #tpu.dot_dimension_numbers<[1], [0], [0], [1], [0, 0, 1, 1], [], []>} : vector<64x32xf32>, vector<32x32xf32>, vector<64x32xf32> -> vector<64x32xf32>
    %49 = arith.addf %46, %48 : vector<64x32xf32>
    %c0_50 = arith.constant 0 : index
    %c0_51 = arith.constant 0 : index
    %50 = vector.load %arg15[%c0_50, %c0_51] : memref<1x32xf32, #tpu.memory_space<vmem>>, vector<1x32xf32>
    %51 = vector.broadcast %50 : vector<1x32xf32> to vector<64x32xf32>
    %52 = arith.addf %49, %51 : vector<64x32xf32>
    %c0_52 = arith.constant 0 : index
    %c0_53 = arith.constant 0 : index
    %c0_54 = arith.constant 0 : index
    %53 = vector.load %arg16[%c0_52, %c0_53, %c0_54] : memref<1x64x32xf32, #tpu.memory_space<vmem>>, vector<1x64x32xf32>
    %54 = vector.shape_cast %53 : vector<1x64x32xf32> to vector<64x32xf32>
    %55 = vector.shape_cast %52 : vector<64x32xf32> to vector<1x64x32xf32>
    tpu.vector_store %arg16[%c0_52, %c0_53, %c0_54], %55 {strides = array<i32>} : memref<1x64x32xf32, #tpu.memory_space<vmem>>, vector<1x64x32xf32>,
    return
  }
  func.func @transform_0(%arg0: i32) -> (i32, i32, i32) {
    %c0_i32 = arith.constant 0 : i32
    %c0_i32_0 = arith.constant 0 : i32
    %c0_i32_1 = arith.constant 0 : i32
    return %arg0, %c0_i32, %c0_i32_0 : i32, i32, i32
  }
  func.func @transform_1(%arg0: i32) -> (i32, i32) {
    %c0_i32 = arith.constant 0 : i32
    %c0_i32_0 = arith.constant 0 : i32
    %c0_i32_1 = arith.constant 0 : i32
    return %c0_i32, %c0_i32_0 : i32, i32
  }
  func.func @transform_2(%arg0: i32) -> (i32, i32) {
    %c0_i32 = arith.constant 0 : i32
    %c0_i32_0 = arith.constant 0 : i32
    %c0_i32_1 = arith.constant 0 : i32
    return %c0_i32, %c0_i32_0 : i32, i32
  }
  func.func @transform_3(%arg0: i32) -> (i32, i32) {
    %c0_i32 = arith.constant 0 : i32
    %c0_i32_0 = arith.constant 0 : i32
    %c0_i32_1 = arith.constant 0 : i32
    return %c0_i32, %c0_i32_0 : i32, i32
  }
  func.func @transform_4(%arg0: i32) -> (i32, i32) {
    %c0_i32 = arith.constant 0 : i32
    %c0_i32_0 = arith.constant 0 : i32
    %c0_i32_1 = arith.constant 0 : i32
    return %c0_i32, %c0_i32_0 : i32, i32
  }
  func.func @transform_5(%arg0: i32) -> (i32, i32) {
    %c0_i32 = arith.constant 0 : i32
    %c0_i32_0 = arith.constant 0 : i32
    %c0_i32_1 = arith.constant 0 : i32
    return %c0_i32, %c0_i32_0 : i32, i32
  }
  func.func @transform_6(%arg0: i32) -> (i32, i32) {
    %c0_i32 = arith.constant 0 : i32
    %c0_i32_0 = arith.constant 0 : i32
    %c0_i32_1 = arith.constant 0 : i32
    return %c0_i32, %c0_i32_0 : i32, i32
  }
  func.func @transform_7(%arg0: i32) -> (i32, i32) {
    %c0_i32 = arith.constant 0 : i32
    %c0_i32_0 = arith.constant 0 : i32
    %c0_i32_1 = arith.constant 0 : i32
    return %c0_i32, %c0_i32_0 : i32, i32
  }
  func.func @transform_8(%arg0: i32) -> (i32, i32) {
    %c0_i32 = arith.constant 0 : i32
    %c0_i32_0 = arith.constant 0 : i32
    %c0_i32_1 = arith.constant 0 : i32
    return %c0_i32, %c0_i32_0 : i32, i32
  }
  func.func @transform_9(%arg0: i32) -> (i32, i32) {
    %c0_i32 = arith.constant 0 : i32
    %c0_i32_0 = arith.constant 0 : i32
    %c0_i32_1 = arith.constant 0 : i32
    return %c0_i32, %c0_i32_0 : i32, i32
  }
  func.func @transform_10(%arg0: i32) -> (i32, i32) {
    %c0_i32 = arith.constant 0 : i32
    %c0_i32_0 = arith.constant 0 : i32
    %c0_i32_1 = arith.constant 0 : i32
    return %c0_i32, %c0_i32_0 : i32, i32
  }
  func.func @transform_11(%arg0: i32) -> (i32, i32) {
    %c0_i32 = arith.constant 0 : i32
    %c0_i32_0 = arith.constant 0 : i32
    %c0_i32_1 = arith.constant 0 : i32
    return %c0_i32, %c0_i32_0 : i32, i32
  }
  func.func @transform_12(%arg0: i32) -> (i32, i32) {
    %c0_i32 = arith.constant 0 : i32
    %c0_i32_0 = arith.constant 0 : i32
    %c0_i32_1 = arith.constant 0 : i32
    return %c0_i32, %c0_i32_0 : i32, i32
  }
  func.func @transform_13(%arg0: i32) -> (i32, i32) {
    %c0_i32 = arith.constant 0 : i32
    %c0_i32_0 = arith.constant 0 : i32
    %c0_i32_1 = arith.constant 0 : i32
    return %c0_i32, %c0_i32_0 : i32, i32
  }
  func.func @transform_14(%arg0: i32) -> (i32, i32) {
    %c0_i32 = arith.constant 0 : i32
    %c0_i32_0 = arith.constant 0 : i32
    %c0_i32_1 = arith.constant 0 : i32
    return %c0_i32, %c0_i32_0 : i32, i32
  }
  func.func @transform_15(%arg0: i32) -> (i32, i32, i32) {
    %c0_i32 = arith.constant 0 : i32
    %c0_i32_0 = arith.constant 0 : i32
    %c0_i32_1 = arith.constant 0 : i32
    return %arg0, %c0_i32, %c0_i32_0 : i32, i32, i32
  }
}

</mosaic_0001>

<bundles_post_ra>
// kernel: squeeze.12
= control target key start
LH: loop header
LB: loop body
LE: loop exit
PB: predicated region body
PF: predicated region fallthrough
CT: control target
= control target key end

     0   :  { %vm7_vm0 = vcmask 130048   ;;  %vm13_vm1 = vcmask 261248   ;;  %s39_s0 = inlined_call_operand.vmem [shape: f32[1,2,16], index: 0, kind: input, shape index: {}]   ;;  %s40_s1 = inlined_call_operand.vmem [shape: f32[1,32], index: 1, kind: output, shape index: {}]  }
   0x1   :  { %v4_v0 = vld [vmem:[%s39_s0] sm:$0x3]  ;;  %s22_s0 = smov 16  }
   0x2   :  { %5 = vst [vmem:[#allocation1] sm:$0x3] %v4_v0 }
   0x9   :  { %v10_v1 = vld [vmem:[#allocation1 + $0x1] sm:$0x1]   ;;  %v6_v2 = vld [vmem:[#allocation1] sm:$0x1]  }
   0xa   :  { %11 = vrot.lane.b32.xlu0 %v10_v1, %s22_s0  ;;  %8 = vst.msk [vmem:[#allocation0] sm:$0x1] %vm7_vm0, %v6_v2  }
  0x7c   :  { %v12_v3 = vpop.permute.xlu0 %11  }
  0x7d   :  { %14 = vst.msk [vmem:[#allocation0] sm:$0x1] %vm13_vm1, %v12_v3  }
  0x84   :  { %v17_v4 = vld [vmem:[#allocation0] sm:$0x1] }
  0x85   :  { %20 = vst [vmem:[%s40_s1] sm:$0x1] %v17_v4 }

// kernel: afno_forward.1
= control target key start
LH: loop header
LB: loop body
LE: loop exit
PB: predicated region body
PF: predicated region fallthrough
CT: control target
= control target key end

     0   :  { %s1503_s18 = smov 0   ;;  %s1812_s0 = inlined_call_operand.vmem [shape: f32[2,64,32], index: 0, kind: input, shape index: {}]   ;;  %s1813_s1 = inlined_call_operand.vmem [shape: f32[40,64], index: 1, kind: input, shape index: {}]   ;;  %s1814_s2 = inlined_call_operand.vmem [shape: f32[40,64], index: 2, kind: input, shape index: {}]   ;;  %s1815_s3 = inlined_call_operand.vmem [shape: f32[64,40], index: 3, kind: input, shape index: {}]   ;;  %s1816_s4 = inlined_call_operand.vmem [shape: f32[64,40], index: 4, kind: input, shape index: {}]   ;;  %s1817_s5 = inlined_call_operand.vmem [shape: f32[32,32], index: 5, kind: input, shape index: {}]   ;;  %s1818_s6 = inlined_call_operand.vmem [shape: f32[32,32], index: 6, kind: input, shape index: {}]   ;;  %s1819_s7 = inlined_call_operand.vmem [shape: f32[32,32], index: 7, kind: input, shape index: {}]   ;;  %s1820_s8 = inlined_call_operand.vmem [shape: f32[32,32], index: 8, kind: input, shape index: {}]   ;;  %s1821_s9 = inlined_call_operand.vmem [shape: f32[1,32], index: 9, kind: input, shape index: {}]   ;;  %s1822_s10 = inlined_call_operand.vmem [shape: f32[1,32], index: 10, kind: input, shape index: {}]   ;;  %s1823_s11 = inlined_call_operand.vmem [shape: f32[1,32], index: 11, kind: input, shape index: {}]   ;;  %s1824_s12 = inlined_call_operand.vmem [shape: f32[1,32], index: 12, kind: input, shape index: {}]   ;;  %s1825_s13 = inlined_call_operand.vmem [shape: f32[32,32], index: 13, kind: input, shape index: {}]   ;;  %s1826_s14 = inlined_call_operand.vmem [shape: f32[1,32], index: 14, kind: input, shape index: {}]   ;;  %s1827_s15 = inlined_call_operand.vmem [shape: f32[2,64,32], index: 15, kind: output, shape index: {}]  }
   0x1 LB: > { %s1311_s19 = sadd.s32 4294967295, %s1421_s18   ;;  %p1315_p0 = scmp.ge.s32.totalorder %s1421_s18, 1  ;;  %s1421_s18 = sphi %s1503_s18, %s25_s18  }
   0x2   : > { %p437_p1 = scmp.lt.s32.totalorder %s1421_s18, 3 }
   0x4   : > { %p438_p2 = pnand %p1315_p0, %p437_p1 }
   0x5   : > { %p485_p3 = scmp.lt.s32.totalorder (!%p438_p2), %s1311_s19, 1 }
   0x6   : > { %441 = sbr.rel (%p438_p2) target bundleno = 870 (0x366), region = 80 }
   0xb   : > { %s1829_s19 = smov (!%p485_p3, %s1311_s19), 1  ;;  %v503_v8 = vld [vmem:[%s1813_s1] sm:$0xff]  ;;  %vm508_vm0 = vcmask 523264   ;;  %v611_v10 = vld [vmem:[%s1817_s5 + $0x18] sm:$0xff]  ;;  %v610_v11 = vld [vmem:[%s1817_s5 + $0x10] sm:$0xff]  ;;  %vm612_vm1 = vcmask 261120  }
   0xc   : > { %s1396_s20 = sshll.u32 %s1829_s19, 6  ;;  %v556_v9 = vld [vmem:[%s1814_s2] sm:$0xff]  ;;  %640 = vmatpush.msra.mxu2 %v611_v10  ;;  %1398 = vmatpush.msra.mxu3 %v611_v10  ;;  %v609_v12 = vld [vmem:[%s1817_s5 + $0x8] sm:$0xff]  ;;  %v505_v15 = vld [vmem:[%s1813_s1 + $0x10] sm:$0xff]  ;;  %vm1028_vm2 = vcmask 326656  }
   0xd   : > { %s489_s23 = scalar_lea.vmem %s1812_s0, %s1396_s20  ;;  %v504_v13 = vld [vmem:[%s1813_s1 + $0x8] sm:$0xff]  ;;  %v558_v16 = vld [vmem:[%s1814_s2 + $0x10] sm:$0xff]  ;;  %v506_v17 = vld [vmem:[%s1813_s1 + $0x18] sm:$0xff]  ;;  %s1791_s17 = scalar_lea.vmem %s1827_s15, %s1396_s20 }
   0xe   : > { %v1519_v0 = vld [vmem:[%s489_s23 + $0x38] sm:$0xff]  ;;  %v1521_v1 = vld [vmem:[%s489_s23 + $0x30] sm:$0xff]  ;;  %v1525_v2 = vld [vmem:[%s489_s23 + $0x28] sm:$0xff]  ;;  %641 = vmatpush.msra.mxu2 %v610_v11  ;;  %1399 = vmatpush.msra.mxu3 %v610_v11 }
   0xf   : > { %532 = vmatpush.msra.mxu0 %v1519_v0  ;;  %584 = vmatpush.msra.mxu1 %v1519_v0  ;;  %v1529_v3 = vld [vmem:[%s489_s23 + $0x20] sm:$0xff]  ;;  %v1533_v4 = vld [vmem:[%s489_s23 + $0x18] sm:$0xff]  ;;  %v1537_v5 = vld [vmem:[%s489_s23 + $0x10] sm:$0xff] }
  0x10   : > { %v1541_v6 = vld [vmem:[%s489_s23 + $0x8] sm:$0xff]  ;;  %v1545_v7 = vld [vmem:[%s489_s23] sm:$0xff]  ;;  %642 = vmatpush.msra.mxu2 %v609_v12  ;;  %1400 = vmatpush.msra.mxu3 %v609_v12  ;;  %v559_v18 = vld [vmem:[%s1814_s2 + $0x18] sm:$0xff] }
  0x11   : > { %533 = vmatpush.msra.mxu0 %v1521_v1  ;;  %585 = vmatpush.msra.mxu1 %v1521_v1  ;;  %v557_v14 = vld [vmem:[%s1814_s2 + $0x8] sm:$0xff]  ;;  %v507_v19 = vld [vmem:[%s1813_s1 + $0x20] sm:$0xff]  ;;  %v663_v23 = vld [vmem:[%s1818_s6 + $0x18] sm:$0xff] }
  0x12   : > { %v560_v20 = vld [vmem:[%s1814_s2 + $0x20] sm:$0xff]  ;;  %v662_v24 = vld [vmem:[%s1818_s6 + $0x10] sm:$0xff]  ;;  %v661_v26 = vld [vmem:[%s1818_s6 + $0x8] sm:$0xff] }
  0x13   : > { %534 = vmatpush.msra.mxu0 %v1525_v2  ;;  %586 = vmatpush.msra.mxu1 %v1525_v2  ;;  %v608_v21 = vld [vmem:[%s1817_s5] sm:$0xff]  ;;  %v811_v36 = vld [vmem:[%s1819_s7 + $0x18] sm:$0xff]  ;;  %v810_v38 = vld [vmem:[%s1819_s7 + $0x10] sm:$0xff] }
  0x14   : > { %643 = vmatpush.msra.mxu2 %v608_v21  ;;  %1401 = vmatpush.msra.mxu3 %v608_v21  ;;  %v660_v27 = vld [vmem:[%s1818_s6] sm:$0xff]  ;;  %v809_v39 = vld [vmem:[%s1819_s7 + $0x8] sm:$0xff]  ;;  %v862_v50 = vld [vmem:[%s1820_s8 + $0x18] sm:$0xff] }
  0x15   : > { %535 = vmatpush.msra.mxu0 %v1529_v3  ;;  %587 = vmatpush.msra.mxu1 %v1529_v3  ;;  %v808_v40 = vld [vmem:[%s1819_s7] sm:$0xff]  ;;  %v861_v53 = vld [vmem:[%s1820_s8 + $0x10] sm:$0xff]  ;;  %v860_v55 = vld [vmem:[%s1820_s8 + $0x8] sm:$0xff] }
  0x16   : > { %742 = vmatpush.msrb.mxu2 %v611_v10  ;;  %691 = vmatpush.msrb.mxu3 %v663_v23  ;;  %v1410_v44 = vld [vmem:[%s1821_s9] ss:$0 sm:$0xff] }
  0x17   : > { %536 = vmatpush.msra.mxu0 %v1533_v4  ;;  %588 = vmatpush.msra.mxu1 %v1533_v4  ;;  %v859_v57 = vld [vmem:[%s1820_s8] sm:$0xff] }
  0x18   : > { %743 = vmatpush.msrb.mxu2 %v610_v11  ;;  %692 = vmatpush.msrb.mxu3 %v662_v24 }
  0x19   : > { %537 = vmatpush.msra.mxu0 %v1537_v5  ;;  %589 = vmatpush.msra.mxu1 %v1537_v5 }
  0x1a   : > { %744 = vmatpush.msrb.mxu2 %v609_v12  ;;  %693 = vmatpush.msrb.mxu3 %v661_v26 }
  0x1b   : > { %538 = vmatpush.msra.mxu0 %v1541_v6  ;;  %590 = vmatpush.msra.mxu1 %v1541_v6 }
  0x1c   : > { %745 = vmatpush.msrb.mxu2 %v608_v21  ;;  %694 = vmatpush.msrb.mxu3 %v660_v27 }
  0x1d   : > { %539 = vmatpush.msra.mxu0 %v1545_v7  ;;  %591 = vmatpush.msra.mxu1 %v1545_v7 }
  0x1e   : > { %1320 = vmatmul.msk.f32.vlgmr.msra.gmra.mxu0 %vm508_vm0, %v503_v8  ;;  %1325 = vmatmul.msk.f32.vlgmr.msra.gmra.mxu1 %vm508_vm0, %v556_v9 }
  0x1f   : > { %839 = vmatpush.msrb.mxu0 %v811_v36  ;;  %890 = vmatpush.msrb.mxu1 %v862_v50 }
  0x21   : > { %840 = vmatpush.msrb.mxu0 %v810_v38  ;;  %891 = vmatpush.msrb.mxu1 %v861_v53 }
  0x23   : > { %841 = vmatpush.msrb.mxu0 %v809_v39  ;;  %892 = vmatpush.msrb.mxu1 %v860_v55 }
  0x25   : > { %842 = vmatpush.msrb.mxu0 %v808_v40  ;;  %893 = vmatpush.msrb.mxu1 %v859_v57 }
  0x26   : > { %1321 = vmatmul.msk.f32.gmra.mxu0 %vm508_vm0, %v504_v13  ;;  %1326 = vmatmul.msk.f32.gmra.mxu1 %vm508_vm0, %v557_v14 }
  0x2e   : > { %1322 = vmatmul.msk.f32.gmra.mxu0 %vm508_vm0, %v505_v15  ;;  %1327 = vmatmul.msk.f32.gmra.mxu1 %vm508_vm0, %v558_v16  ;;  %v1411_v15 = vld [vmem:[%s1822_s10] ss:$0 sm:$0xff] }
  0x36   : > { %1323 = vmatmul.msk.f32.gmra.mxu0 %vm508_vm0, %v506_v17  ;;  %1328 = vmatmul.msk.f32.gmra.mxu1 %vm508_vm0, %v559_v18 }
  0x3e   : > { %1324 = vmatmul.msk.f32.gmra.mxu0 %vm508_vm0, %v507_v19  ;;  %1329 = vmatmul.msk.f32.gmra.mxu1 %vm508_vm0, %v560_v20 }
  0x9b   : > { %v541_v22 = vpop.f32.mrf.mxu0  ;;  %v593_v25 = vpop.f32.mrf.mxu1 }
  0x9c   : > { %1330 = vmatmul.msk.f32.vlgmr.msra.gmra.mxu2 %vm612_vm1, %v541_v22 }
  0x9d   : > { %936 = vmatpush.msra.mxu2 %v811_v36 }
  0x9f   : > { %937 = vmatpush.msra.mxu2 %v810_v38 }
  0xa1   : > { %938 = vmatpush.msra.mxu2 %v809_v39 }
  0xa3   : > { %v544_v28 = vpop.f32.mrf.mxu0  ;;  %v596_v29 = vpop.f32.mrf.mxu1  ;;  %939 = vmatpush.msra.mxu2 %v808_v40 }
  0xa4   : > { %1331 = vmatmul.msk.f32.vlgmr.msra.gmra.mxu3 %vm612_vm1, %v544_v28  ;;  %1340 = vmatmul.msk.f32.vlgmr.msrb.gmra.mxu2 %vm612_vm1, %v593_v25 }
  0xa5   : > { %774 = vmatpush.msra.mxu3 %v663_v23 }
  0xa7   : > { %775 = vmatpush.msra.mxu3 %v662_v24 }
  0xa9   : > { %776 = vmatpush.msra.mxu3 %v661_v26 }
  0xab   : > { %v547_v30 = vpop.f32.mrf.mxu0  ;;  %777 = vmatpush.msra.mxu3 %v660_v27  ;;  %v599_v31 = vpop.f32.mrf.mxu1 }
  0xac   : > { %1332 = vmatmul.msk.f32.gmra.mxu3 %vm612_vm1, %v547_v30  ;;  %1341 = vmatmul.msk.f32.gmra.mxu2 %vm612_vm1, %v596_v29 }
  0xb3   : > { %v550_v32 = vpop.f32.mrf.mxu0  ;;  %v602_v33 = vpop.f32.mrf.mxu1 }
  0xb4   : > { %1333 = vmatmul.msk.f32.gmra.mxu3 %vm612_vm1, %v550_v32  ;;  %1342 = vmatmul.msk.f32.gmra.mxu2 %vm612_vm1, %v599_v31 }
  0xbb   : > { %v553_v34 = vpop.f32.mrf.mxu0  ;;  %v605_v35 = vpop.f32.mrf.mxu1 }
  0xbc   : > { %1334 = vmatmul.msk.f32.gmra.mxu3 %vm612_vm1, %v553_v34  ;;  %1343 = vmatmul.msk.f32.gmra.mxu2 %vm612_vm1, %v602_v33 }
  0xc4   : > { %1335 = vmatmul.msk.f32.vlgmr.msrb.gmra.mxu3 %vm612_vm1, %v593_v25  ;;  %1344 = vmatmul.msk.f32.gmra.mxu2 %vm612_vm1, %v605_v35 }
  0xc5   : > { %983 = vmatpush.msrb.mxu3 %v862_v50 }
  0xc7   : > { %984 = vmatpush.msrb.mxu3 %v861_v53 }
  0xc9   : > { %985 = vmatpush.msrb.mxu3 %v860_v55 }
  0xcb   : > { %986 = vmatpush.msrb.mxu3 %v859_v57 }
  0xcc   : > { %1336 = vmatmul.msk.f32.gmra.mxu3 %vm612_vm1, %v596_v29 }
  0xd4   : > { %1337 = vmatmul.msk.f32.gmra.mxu3 %vm612_vm1, %v599_v31 }
  0xdc   : > { %1338 = vmatmul.msk.f32.gmra.mxu3 %vm612_vm1, %v602_v33 }
  0xe4   : > { %1339 = vmatmul.msk.f32.gmra.mxu3 %vm612_vm1, %v605_v35 }
  0xec   : > { %1345 = vmatmul.msk.f32.vlgmr.msra.gmra.mxu3 %vm612_vm1, %v541_v22 }
  0xf4   : > { %1346 = vmatmul.msk.f32.gmra.mxu3 %vm612_vm1, %v544_v28 }
  0xfc   : > { %1347 = vmatmul.msk.f32.gmra.mxu3 %vm612_vm1, %v547_v30 }
 0x104   : > { %1348 = vmatmul.msk.f32.gmra.mxu3 %vm612_vm1, %v550_v32 }
 0x10c   : > { %1349 = vmatmul.msk.f32.gmra.mxu3 %vm612_vm1, %v553_v34 }
 0x11f   : > { %v645_v45 = vpop.f32.mrf.mxu2 }
 0x127   : > { %v648_v37 = vpop.f32.mrf.mxu3  ;;  %v747_v10 = vpop.f32.mrf.mxu2 }
 0x12f   : > { %v651_v41 = vpop.f32.mrf.mxu3  ;;  %v750_v18 = vpop.f32.mrf.mxu2 }
 0x137   : > { %v654_v42 = vpop.f32.mrf.mxu3  ;;  %v753_v24 = vpop.f32.mrf.mxu2 }
 0x13f   : > { %v657_v43 = vpop.f32.mrf.mxu3  ;;  %v756_v30 = vpop.f32.mrf.mxu2 }
 0x147   : > { %v696_v46 = vpop.f32.mrf.mxu3  ;;  %v759_v35 = vpop.f32.mrf.mxu2 }
 0x148   : > { %v711_v47 = vsub.f32 %v645_v45, %v696_v46 }
 0x14a   : > { %v720_v48 = vadd.f32 %v1410_v44, %v711_v47 }
 0x14c   : > { %v725_v49 = vmax.f32 %v720_v48, 0.0 }
 0x14e   : > { %1350 = vmatmul.msk.f32.vlgmr.msrb.gmra.mxu0 %vm612_vm1, %v725_v49 }
 0x14f   : > { %v699_v51 = vpop.f32.mrf.mxu3 }
 0x150   : > { %v712_v52 = vsub.f32 %v648_v37, %v699_v51 }
 0x152   : > { %v721_v54 = vadd.f32 %v1410_v44, %v712_v52 }
 0x154   : > { %v726_v56 = vmax.f32 %v721_v54, 0.0 }
 0x156   : > { %1351 = vmatmul.msk.f32.gmra.mxu0 %vm612_vm1, %v726_v56 }
 0x157   : > { %v702_v58 = vpop.f32.mrf.mxu3 }
 0x158   : > { %v713_v59 = vsub.f32 %v651_v41, %v702_v58  ;;  %v1412_v41 = vld [vmem:[%s1823_s11] ss:$0 sm:$0xff] }
 0x15a   : > { %v722_v60 = vadd.f32 %v1410_v44, %v713_v59 }
 0x15c   : > { %v727_v61 = vmax.f32 %v722_v60, 0.0 }
 0x15e   : > { %1352 = vmatmul.msk.f32.gmra.mxu0 %vm612_vm1, %v727_v61 }
 0x15f   : > { %v705_v62 = vpop.f32.mrf.mxu3 }
 0x160   : > { %v714_v63 = vsub.f32 %v654_v42, %v705_v62 }
 0x162   : > { %v723_v8 = vadd.f32 %v1410_v44, %v714_v63 }
 0x164   : > { %v728_v9 = vmax.f32 %v723_v8, 0.0  ;;  %v1162_v8 = vld [vmem:[%s1825_s13 + $0x18] sm:$0xff] }
 0x165   : > { %1199 = vmatpush.msrb.mxu2 %v1162_v8 }
 0x166   : > { %1353 = vmatmul.msk.f32.gmra.mxu0 %vm612_vm1, %v728_v9  ;;  %v1161_v9 = vld [vmem:[%s1825_s13 + $0x10] sm:$0xff] }
 0x167   : > { %v708_v11 = vpop.f32.mrf.mxu3  ;;  %1200 = vmatpush.msrb.mxu2 %v1161_v9 }
 0x168   : > { %v715_v12 = vsub.f32 %v657_v43, %v708_v11 }
 0x16a   : > { %v724_v13 = vadd.f32 %v1410_v44, %v715_v12  ;;  %v1159_v12 = vld [vmem:[%s1825_s13] sm:$0xff] }
 0x16c   : > { %v729_v14 = vmax.f32 %v724_v13, 0.0 }
 0x16e   : > { %1354 = vmatmul.msk.f32.gmra.mxu0 %vm612_vm1, %v729_v14  ;;  %v1012_v14 = vld [vmem:[%s1815_s3] sm:$0xff] }
 0x16f   : > { %v779_v16 = vpop.f32.mrf.mxu3 }
 0x170   : > { %v780_v17 = vadd.f32 %v779_v16, %v747_v10  ;;  %v1160_v10 = vld [vmem:[%s1825_s13 + $0x8] sm:$0xff] }
 0x171   : > { %1201 = vmatpush.msrb.mxu2 %v1160_v10  ;;  %v1013_v16 = vld [vmem:[%s1815_s3 + $0x8] sm:$0xff] }
 0x172   : > { %v798_v19 = vadd.f32 %v1411_v15, %v780_v17 }
 0x173   : > { %1202 = vmatpush.msrb.mxu2 %v1159_v12 }
 0x174   : > { %v803_v20 = vmax.f32 %v798_v19, 0.0 }
 0x176   : > { %1355 = vmatmul.msk.f32.vlgmr.msrb.gmra.mxu1 %vm612_vm1, %v803_v20  ;;  %1360 = vmatmul.msk.f32.vlgmr.msra.gmra.mxu2 %vm612_vm1, %v803_v20 }
 0x177   : > { %v782_v21 = vpop.f32.mrf.mxu3 }
 0x178   : > { %v783_v22 = vadd.f32 %v782_v21, %v750_v18  ;;  %v1014_v18 = vld [vmem:[%s1815_s3 + $0x10] sm:$0xff] }
 0x17a   : > { %v799_v23 = vadd.f32 %v1411_v15, %v783_v22 }
 0x17c   : > { %v804_v25 = vmax.f32 %v799_v23, 0.0 }
 0x17e   : > { %1356 = vmatmul.msk.f32.gmra.mxu1 %vm612_vm1, %v804_v25  ;;  %1361 = vmatmul.msk.f32.gmra.mxu2 %vm612_vm1, %v804_v25 }
 0x17f   : > { %v785_v26 = vpop.f32.mrf.mxu3 }
 0x180   : > { %v786_v27 = vadd.f32 %v785_v26, %v753_v24  ;;  %v1015_v26 = vld [vmem:[%s1815_s3 + $0x18] sm:$0xff] }
 0x182   : > { %v800_v28 = vadd.f32 %v1411_v15, %v786_v27 }
 0x184   : > { %v805_v29 = vmax.f32 %v800_v28, 0.0 }
 0x186   : > { %1357 = vmatmul.msk.f32.gmra.mxu1 %vm612_vm1, %v805_v29  ;;  %1362 = vmatmul.msk.f32.gmra.mxu2 %vm612_vm1, %v805_v29 }
 0x187   : > { %v788_v31 = vpop.f32.mrf.mxu3 }
 0x188   : > { %v789_v32 = vadd.f32 %v788_v31, %v756_v30  ;;  %v1020_v30 = vld [vmem:[%s1816_s4] sm:$0xff] }
 0x189   : > { %v1016_v31 = vld [vmem:[%s1815_s3 + $0x20] sm:$0xff] }
 0x18a   : > { %v801_v33 = vadd.f32 %v1411_v15, %v789_v32  ;;  %v1017_v32 = vld [vmem:[%s1815_s3 + $0x28] sm:$0xff] }
 0x18c   : > { %v806_v34 = vmax.f32 %v801_v33, 0.0  ;;  %v1022_v33 = vld [vmem:[%s1816_s4 + $0x10] sm:$0xff] }
 0x18e   : > { %1358 = vmatmul.msk.f32.gmra.mxu1 %vm612_vm1, %v806_v34  ;;  %1363 = vmatmul.msk.f32.gmra.mxu2 %vm612_vm1, %v806_v34  ;;  %v1023_v34 = vld [vmem:[%s1816_s4 + $0x18] sm:$0xff] }
 0x18f   : > { %v791_v36 = vpop.f32.mrf.mxu3 }
 0x190   : > { %v792_v37 = vadd.f32 %v791_v36, %v759_v35  ;;  %v1024_v35 = vld [vmem:[%s1816_s4 + $0x20] sm:$0xff]  ;;  %v1026_v36 = vld [vmem:[%s1816_s4 + $0x30] sm:$0xff] }
 0x192   : > { %v802_v38 = vadd.f32 %v1411_v15, %v792_v37  ;;  %v1027_v37 = vld [vmem:[%s1816_s4 + $0x38] sm:$0xff] }
 0x194   : > { %v807_v39 = vmax.f32 %v802_v38, 0.0 }
 0x196   : > { %1359 = vmatmul.msk.f32.gmra.mxu1 %vm612_vm1, %v807_v39  ;;  %1364 = vmatmul.msk.f32.gmra.mxu2 %vm612_vm1, %v807_v39 }
 0x19e   : > { %1386 = vmatmul.msk.f32.vlgmr.msrb.gmra.mxu2 %vm612_vm1, %v1545_v7 }
 0x1a6   : > { %1387 = vmatmul.msk.f32.gmra.mxu2 %vm612_vm1, %v1541_v6  ;;  %v1413_v6 = vld [vmem:[%s1824_s12] ss:$0 sm:$0xff] }
 0x1ae   : > { %1388 = vmatmul.msk.f32.gmra.mxu2 %vm612_vm1, %v1537_v5 }
 0x1b6   : > { %1389 = vmatmul.msk.f32.gmra.mxu2 %vm612_vm1, %v1533_v4 }
 0x1be   : > { %1390 = vmatmul.msk.f32.gmra.mxu2 %vm612_vm1, %v1529_v3  ;;  %v1021_v3 = vld [vmem:[%s1816_s4 + $0x8] sm:$0xff] }
 0x1c6   : > { %1391 = vmatmul.msk.f32.gmra.mxu2 %vm612_vm1, %v1525_v2  ;;  %v1018_v2 = vld [vmem:[%s1815_s3 + $0x30] sm:$0xff] }
 0x1cb   : > { %v844_v40 = vpop.f32.mrf.mxu0 }
 0x1ce   : > { %1392 = vmatmul.msk.f32.gmra.mxu2 %vm612_vm1, %v1521_v1  ;;  %v1019_v1 = vld [vmem:[%s1815_s3 + $0x38] sm:$0xff] }
 0x1d3   : > { %v847_v44 = vpop.f32.mrf.mxu0 }
 0x1d6   : > { %1393 = vmatmul.msk.f32.gmra.mxu2 %vm612_vm1, %v1519_v0  ;;  %v1025_v0 = vld [vmem:[%s1816_s4 + $0x28] sm:$0xff] }
 0x1db   : > { %v850_v49 = vpop.f32.mrf.mxu0 }
 0x1e3   : > { %v853_v53 = vpop.f32.mrf.mxu0 }
 0x1eb   : > { %v856_v57 = vpop.f32.mrf.mxu0 }
 0x1f3   : > { %v895_v42 = vpop.f32.mrf.mxu1 }
 0x1f4   : > { %v910_v43 = vsub.f32 %v844_v40, %v895_v42 }
 0x1f6   : > { %v919_v45 = vadd.f32 %v1412_v41, %v910_v43 }
 0x1f8   : > { %1365 = vmatmul.msk.f32.vlgmr.msrb.gmra.mxu3 %vm612_vm1, %v919_v45 }
 0x1f9   : > { %v941_v61 = vpop.f32.mrf.mxu2 }
 0x1fb   : > { %v898_v46 = vpop.f32.mrf.mxu1 }
 0x1fc   : > { %v911_v47 = vsub.f32 %v847_v44, %v898_v46  ;;  %v1414_v44 = vld [vmem:[%s1826_s14] ss:$0 sm:$0xff] }
 0x1fe   : > { %v920_v48 = vadd.f32 %v1412_v41, %v911_v47 }
 0x200   : > { %1366 = vmatmul.msk.f32.gmra.mxu3 %vm612_vm1, %v920_v48 }
 0x201   : > { %v944_v63 = vpop.f32.mrf.mxu2 }
 0x203   : > { %v901_v50 = vpop.f32.mrf.mxu1 }
 0x204   : > { %v912_v51 = vsub.f32 %v850_v49, %v901_v50 }
 0x206   : > { %v921_v52 = vadd.f32 %v1412_v41, %v912_v51 }
 0x208   : > { %1367 = vmatmul.msk.f32.gmra.mxu3 %vm612_vm1, %v921_v52 }
 0x209   : > { %v947_v13 = vpop.f32.mrf.mxu2 }
 0x20b   : > { %v904_v54 = vpop.f32.mrf.mxu1 }
 0x20c   : > { %v913_v55 = vsub.f32 %v853_v53, %v904_v54 }
 0x20e   : > { %v922_v56 = vadd.f32 %v1412_v41, %v913_v55 }
 0x210   : > { %1368 = vmatmul.msk.f32.gmra.mxu3 %vm612_vm1, %v922_v56 }
 0x211   : > { %v950_v17 = vpop.f32.mrf.mxu2 }
 0x213   : > { %v907_v58 = vpop.f32.mrf.mxu1 }
 0x214   : > { %v914_v59 = vsub.f32 %v856_v57, %v907_v58 }
 0x216   : > { %v923_v60 = vadd.f32 %v1412_v41, %v914_v59 }
 0x218   : > { %1369 = vmatmul.msk.f32.gmra.mxu3 %vm612_vm1, %v923_v60  ;;  %1129 = vmatpush.msra.mxu1 %v923_v60 }
 0x219   : > { %v953_v19 = vpop.f32.mrf.mxu2 }
 0x21a   : > { %1130 = vmatpush.msra.mxu1 %v922_v56 }
 0x21c   : > { %1131 = vmatpush.msra.mxu1 %v921_v52 }
 0x21e   : > { %1132 = vmatpush.msra.mxu1 %v920_v48 }
 0x220   : > { %1133 = vmatpush.msra.mxu1 %v919_v45 }
 0x221   : > { %1378 = vmatmul.msk.f32.vlgmr.msra.gmra.mxu1 %vm1028_vm2, %v1012_v14  ;;  %v1204_v39 = vpop.f32.mrf.mxu2 }
 0x229   : > { %1379 = vmatmul.msk.f32.gmra.mxu1 %vm1028_vm2, %v1013_v16  ;;  %v1207_v41 = vpop.f32.mrf.mxu2 }
 0x231   : > { %1380 = vmatmul.msk.f32.gmra.mxu1 %vm1028_vm2, %v1014_v18  ;;  %v1210_v48 = vpop.f32.mrf.mxu2 }
 0x239   : > { %1381 = vmatmul.msk.f32.gmra.mxu1 %vm1028_vm2, %v1015_v26  ;;  %v1213_v55 = vpop.f32.mrf.mxu2 }
 0x241   : > { %1382 = vmatmul.msk.f32.gmra.mxu1 %vm1028_vm2, %v1016_v31 }
 0x249   : > { %1383 = vmatmul.msk.f32.gmra.mxu1 %vm1028_vm2, %v1017_v32 }
 0x251   : > { %1384 = vmatmul.msk.f32.gmra.mxu1 %vm1028_vm2, %v1018_v2 }
 0x259   : > { %1385 = vmatmul.msk.f32.gmra.mxu1 %vm1028_vm2, %v1019_v1 }
 0x27b   : > { %v988_v62 = vpop.f32.mrf.mxu3 }
 0x27c   : > { %v989_v27 = vadd.f32 %v988_v62, %v941_v61  ;;  %v1216_v62 = vpop.f32.mrf.mxu2 }
 0x27e   : > { %v1007_v4 = vadd.f32 %v1413_v6, %v989_v27 }
 0x283   : > { %v991_v11 = vpop.f32.mrf.mxu3 }
 0x284   : > { %v992_v5 = vadd.f32 %v991_v11, %v944_v63 }
 0x286   : > { %v1008_v29 = vadd.f32 %v1413_v6, %v992_v5 }
 0x28b   : > { %v994_v15 = vpop.f32.mrf.mxu3 }
 0x28c   : > { %v995_v23 = vadd.f32 %v994_v15, %v947_v13  ;;  %v1219_v13 = vpop.f32.mrf.mxu2 }
 0x28e   : > { %v1009_v28 = vadd.f32 %v1413_v6, %v995_v23 }
 0x293   : > { %v997_v7 = vpop.f32.mrf.mxu3 }
 0x294   : > { %v998_v21 = vadd.f32 %v997_v7, %v950_v17 }
 0x296   : > { %v1010_v25 = vadd.f32 %v1413_v6, %v998_v21 }
 0x29b   : > { %v1000_v20 = vpop.f32.mrf.mxu3 }
 0x29c   : > { %v1001_v22 = vadd.f32 %v1000_v20, %v953_v19  ;;  %v1222_v19 = vpop.f32.mrf.mxu2 }
 0x29e   : > { %v1011_v24 = vadd.f32 %v1413_v6, %v1001_v22  ;;  %v1135_v38 = vpop.f32.mrf.mxu1 }
 0x2a0   : > { %1064 = vmatpush.msra.mxu0 %v1011_v24 }
 0x2a2   : > { %1065 = vmatpush.msra.mxu0 %v1010_v25 }
 0x2a4   : > { %1066 = vmatpush.msra.mxu0 %v1009_v28  ;;  %v1225_v5 = vpop.f32.mrf.mxu2 }
 0x2a6   : > { %1067 = vmatpush.msra.mxu0 %v1008_v29  ;;  %v1138_v40 = vpop.f32.mrf.mxu1 }
 0x2a8   : > { %1068 = vmatpush.msra.mxu0 %v1007_v4 }
 0x2a9   : > { %1370 = vmatmul.msk.f32.vlgmr.msra.gmra.mxu0 %vm1028_vm2, %v1020_v30 }
 0x2ae   : > { %v1141_v46 = vpop.f32.mrf.mxu1 }
 0x2b1   : > { %1371 = vmatmul.msk.f32.gmra.mxu0 %vm1028_vm2, %v1021_v3 }
 0x2b6   : > { %v1144_v53 = vpop.f32.mrf.mxu1 }
 0x2b9   : > { %1372 = vmatmul.msk.f32.gmra.mxu0 %vm1028_vm2, %v1022_v33 }
 0x2be   : > { %v1147_v60 = vpop.f32.mrf.mxu1 }
 0x2c1   : > { %1373 = vmatmul.msk.f32.gmra.mxu0 %vm1028_vm2, %v1023_v34 }
 0x2c6   : > { %v1150_v11 = vpop.f32.mrf.mxu1 }
 0x2c9   : > { %1374 = vmatmul.msk.f32.gmra.mxu0 %vm1028_vm2, %v1024_v35 }
 0x2ce   : > { %v1153_v7 = vpop.f32.mrf.mxu1 }
 0x2d1   : > { %1375 = vmatmul.msk.f32.gmra.mxu0 %vm1028_vm2, %v1025_v0 }
 0x2d6   : > { %v1156_v23 = vpop.f32.mrf.mxu1 }
 0x2d9   : > { %1376 = vmatmul.msk.f32.gmra.mxu0 %vm1028_vm2, %v1026_v36 }
 0x2e1   : > { %1377 = vmatmul.msk.f32.gmra.mxu0 %vm1028_vm2, %v1027_v37 }
 0x326   : > { %v1070_v42 = vpop.f32.mrf.mxu0 }
 0x327   : > { %v1136_v43 = vadd.f32 %v1135_v38, %v1070_v42 }
 0x329   : > { %v1228_v45 = vadd.f32 %v1204_v39, %v1136_v43 }
 0x32b   : > { %v1240_v47 = vadd.f32 %v1414_v44, %v1228_v45 }
 0x32d   : > { %1248 = vst.msk [vmem:[%s1791_s17] sm:$0xff] %vm612_vm1, %v1240_v47 }
 0x32e   : > { %v1073_v49 = vpop.f32.mrf.mxu0 }
 0x32f   : > { %v1139_v50 = vadd.f32 %v1138_v40, %v1073_v49 }
 0x331   : > { %v1229_v51 = vadd.f32 %v1207_v41, %v1139_v50 }
 0x333   : > { %v1241_v52 = vadd.f32 %v1414_v44, %v1229_v51 }
 0x335   : > { %1249 = vst.msk [vmem:[%s1791_s17 + $0x8] sm:$0xff] %vm612_vm1, %v1241_v52 }
 0x336   : > { %v1076_v54 = vpop.f32.mrf.mxu0 }
 0x337   : > { %v1142_v56 = vadd.f32 %v1141_v46, %v1076_v54 }
 0x339   : > { %v1230_v57 = vadd.f32 %v1210_v48, %v1142_v56 }
 0x33b   : > { %v1242_v58 = vadd.f32 %v1414_v44, %v1230_v57 }
 0x33d   : > { %1250 = vst.msk [vmem:[%s1791_s17 + $0x10] sm:$0xff] %vm612_vm1, %v1242_v58 }
 0x33e   : > { %v1079_v59 = vpop.f32.mrf.mxu0 }
 0x33f   : > { %v1145_v61 = vadd.f32 %v1144_v53, %v1079_v59 }
 0x341   : > { %v1231_v63 = vadd.f32 %v1213_v55, %v1145_v61 }
 0x343   : > { %v1243_v8 = vadd.f32 %v1414_v44, %v1231_v63 }
 0x345   : > { %1251 = vst.msk [vmem:[%s1791_s17 + $0x18] sm:$0xff] %vm612_vm1, %v1243_v8 }
 0x346   : > { %v1082_v9 = vpop.f32.mrf.mxu0 }
 0x347   : > { %v1148_v10 = vadd.f32 %v1147_v60, %v1082_v9 }
 0x349   : > { %v1232_v12 = vadd.f32 %v1216_v62, %v1148_v10 }
 0x34b   : > { %v1244_v14 = vadd.f32 %v1414_v44, %v1232_v12 }
 0x34d   : > { %1252 = vst.msk [vmem:[%s1791_s17 + $0x20] sm:$0xff] %vm612_vm1, %v1244_v14 }
 0x34e   : > { %v1085_v15 = vpop.f32.mrf.mxu0 }
 0x34f   : > { %v1151_v16 = vadd.f32 %v1150_v11, %v1085_v15 }
 0x351   : > { %v1233_v17 = vadd.f32 %v1219_v13, %v1151_v16 }
 0x353   : > { %v1245_v18 = vadd.f32 %v1414_v44, %v1233_v17 }
 0x355   : > { %1253 = vst.msk [vmem:[%s1791_s17 + $0x28] sm:$0xff] %vm612_vm1, %v1245_v18 }
 0x356   : > { %v1088_v20 = vpop.f32.mrf.mxu0 }
 0x357   : > { %v1154_v6 = vadd.f32 %v1153_v7, %v1088_v20 }
 0x359   : > { %v1234_v21 = vadd.f32 %v1222_v19, %v1154_v6 }
 0x35b   : > { %v1246_v22 = vadd.f32 %v1414_v44, %v1234_v21 }
 0x35d   : > { %1254 = vst.msk [vmem:[%s1791_s17 + $0x30] sm:$0xff] %vm612_vm1, %v1246_v22 }
 0x35e   : > { %v1091_v24 = vpop.f32.mrf.mxu0 }
 0x35f   : > { %v1157_v25 = vadd.f32 %v1156_v23, %v1091_v24 }
 0x361   : > { %v1235_v26 = vadd.f32 %v1225_v5, %v1157_v25 }
 0x363   : > { %v1247_v27 = vadd.f32 %v1414_v44, %v1235_v26 }
 0x365   : > { %1255 = vst.msk [vmem:[%s1791_s17 + $0x38] sm:$0xff] %vm612_vm1, %v1247_v27 }
 0x366 PF: > { %s25_s18 = sadd.s32 1, %s1421_s18  }
 0x367   : > { %p22_p4 = scmp.ge.s32.totalorder %s25_s18, 4  }
 0x369   :  { %24 = sbr.rel (!%p22_p4) target bundleno = 1 (0x1), region = 110 }

</bundles_post_ra>
